<compile_context>
chip_gen: v6e
topology: v6e:2x2x1
jax: 0.10.0
libtpu: 0.0.40
codegen_flags: <defaults>
</compile_context>

<pallas_src>
import functools
import math

import jax
import jax.numpy as jnp
from jax import lax
from jax.experimental import pallas as pl
from jax.experimental.pallas import tpu as pltpu

# TODO(synk): PyTorch derives vocab_size by reading config['vocab_path']; no file I/O here,
# so the vocab size is a fixed synthetic constant.
VOCAB = 64
HIDDEN = 32
SENT_LEN = 8
BATCH = 2
MARGIN = 0.5  # config['margin'] for TripletMarginLoss

_VMEM = functools.partial(pl.BlockSpec, memory_space=pltpu.MemorySpace.VMEM)


# ----------------------------- shared in-kernel helpers ------------------------
def _onehot(ids_col, vpad):
    """ids_col: (N, 1) int32 -> (N, vpad) f32 one-hot (padded rows never selected)."""
    n = ids_col.shape[0]
    return (ids_col == lax.broadcasted_iota(jnp.int32, (n, vpad), 1)).astype(jnp.float32)


def _seq_max(y, batch, seq_len):
    """(batch*seq_len, H) -> (batch, H): max over the sequence == MaxPool1d(sentence_len)."""
    return jnp.max(y.reshape(batch, seq_len, y.shape[-1]), axis=1)


# ----------------------------- fused kernels -----------------------------------
def _encode_kernel(ids_ref, tbl_ref, out_ref, *, batch, seq_len, vpad):
    # Single MXU matmul: one-hot gather against the pre-fused (Embedding o Linear) table.
    y = jnp.dot(_onehot(ids_ref[...], vpad), tbl_ref[...],
                preferred_element_type=jnp.float32)           # (B*S, H)
    out_ref[...] = _seq_max(y, batch, seq_len)                # one (B, H) store


def _triplet_kernel(a_ref, p_ref, n_ref, tbl_ref, out_ref,
                    *, batch, seq_len, vpad, margin):
    # Three sentences, one matmul: concat the one-hots in VMEM (sublane axis, K=vpad lanes).
    oh = jnp.concatenate([_onehot(a_ref[...], vpad),
                          _onehot(p_ref[...], vpad),
                          _onehot(n_ref[...], vpad)], axis=0)  # (3*B*S, vpad)
    y = jnp.dot(oh, tbl_ref[...], preferred_element_type=jnp.float32)
    bs = batch * seq_len                                       # slice offsets multiple of 8
    a = _seq_max(y[0:bs], batch, seq_len)
    p = _seq_max(y[bs:2 * bs], batch, seq_len)
    n = _seq_max(y[2 * bs:3 * bs], batch, seq_len)
    eps = 1e-6  # torch pairwise_distance default eps (added before the norm)
    d_ap = jnp.sqrt(jnp.sum((a - p + eps) ** 2, axis=-1, keepdims=True))
    d_an = jnp.sqrt(jnp.sum((a - n + eps) ** 2, axis=-1, keepdims=True))
    loss = jnp.maximum(d_ap - d_an + margin, 0.0)
    out_ref[...] = jnp.sum(loss, keepdims=True) / batch        # mean reduction


def _cosine_kernel(s1_ref, s2_ref, tgt_ref, tbl_ref, out_ref,
                   *, batch, seq_len, vpad, margin):
    oh = jnp.concatenate([_onehot(s1_ref[...], vpad),
                          _onehot(s2_ref[...], vpad)], axis=0)  # (2*B*S, vpad)
    y = jnp.dot(oh, tbl_ref[...], preferred_element_type=jnp.float32)
    bs = batch * seq_len
    x1 = _seq_max(y[0:bs], batch, seq_len)
    x2 = _seq_max(y[bs:2 * bs], batch, seq_len)
    eps = 1e-8  # torch cosine_similarity eps; clamps EACH norm separately
    dot = jnp.sum(x1 * x2, axis=-1, keepdims=True)
    n1 = jnp.sqrt(jnp.sum(x1 * x1, axis=-1, keepdims=True))
    n2 = jnp.sqrt(jnp.sum(x2 * x2, axis=-1, keepdims=True))
    cos = dot / (jnp.maximum(n1, eps) * jnp.maximum(n2, eps))
    tvec = tgt_ref[...]                                          # (B, 1) f32, one VMEM load
    loss = jnp.where(tvec > 0, 1.0 - cos, jnp.maximum(cos - margin, 0.0))
    out_ref[...] = jnp.sum(loss, keepdims=True) / batch          # mean reduction


# ----------------------------- pallas_call wrappers ----------------------------
def pallas_encode(ids, table):
    B, S = ids.shape
    H = table.shape[1]
    kernel = functools.partial(_encode_kernel, batch=B, seq_len=S, vpad=table.shape[0])
    return pl.pallas_call(
        kernel,
        out_shape=jax.ShapeDtypeStruct((B, H), jnp.float32),
        in_specs=[_VMEM(), _VMEM()],
        out_specs=_VMEM(),
    )(ids.reshape(B * S, 1).astype(jnp.int32), table)


def pallas_triplet_loss_fused(ids1, ids2, ids3, table, margin):
    B, S = ids1.shape
    kernel = functools.partial(_triplet_kernel, batch=B, seq_len=S,
                               vpad=table.shape[0], margin=float(margin))
    res = pl.pallas_call(
        kernel,
        out_shape=jax.ShapeDtypeStruct((1, 1), jnp.float32),
        in_specs=[_VMEM()] * 4,
        out_specs=_VMEM(),
    )(ids1.reshape(B * S, 1).astype(jnp.int32),
      ids2.reshape(B * S, 1).astype(jnp.int32),
      ids3.reshape(B * S, 1).astype(jnp.int32),
      table)
    return res[0, 0]


def pallas_cosine_loss_fused(ids1, ids2, target, table, margin=0.0):
    B, S = ids1.shape
    kernel = functools.partial(_cosine_kernel, batch=B, seq_len=S,
                               vpad=table.shape[0], margin=float(margin))
    res = pl.pallas_call(
        kernel,
        out_shape=jax.ShapeDtypeStruct((1, 1), jnp.float32),
        in_specs=[_VMEM()] * 4,
        out_specs=_VMEM(),
    )(ids1.reshape(B * S, 1).astype(jnp.int32),
      ids2.reshape(B * S, 1).astype(jnp.int32),
      target.reshape(B, 1).astype(jnp.float32),
      table)
    return res[0, 0]


# ----------------------------- module wrapper ----------------------------------
class SiameseNetworkPallas:
    def __init__(self, config, key):
        vocab_size = config["vocab_size"]
        hidden = config["hidden_size"]
        self.margin = config["margin"]
        k1, k2, k3 = jax.random.split(key, 3)
        # nn.Embedding init ~ N(0,1); nn.Linear init ~ U(-1/sqrt(in), 1/sqrt(in)).
        self.embedding = jax.random.normal(k1, (vocab_size + 1, hidden), jnp.float32)
        bound = 1.0 / math.sqrt(hidden)
        w = jax.random.uniform(k2, (hidden, hidden), jnp.float32, -bound, bound)  # (out, in)
        self.w_t = jnp.asarray(w.T)                                               # (in, out)
        self.b = jax.random.uniform(k3, (1, hidden), jnp.float32, -bound, bound)

        # Fold the Linear into the embedding table (exact for a one-hot gather):
        #   onehot @ (E @ W^T + b)  ==  Linear(Embedding(ids))
        fused = jnp.dot(self.embedding, self.w_t,
                        precision=lax.Precision.HIGHEST) + self.b
        rows = vocab_size + 1
        vpad = ((rows + 127) // 128) * 128   # 65 -> 128: MXU-aligned contraction dim
        self.table = jnp.zeros((vpad, hidden), jnp.float32).at[:rows, :].set(fused)

    def encode(self, ids):
        return pallas_encode(ids, self.table)

    def __call__(self, sentence1, sentence2=None, sentence3=None, target=None):
        if sentence2 is None:
            return self.encode(sentence1)
        elif sentence3 is not None:
            return pallas_triplet_loss_fused(sentence1, sentence2, sentence3,
                                             self.table, self.margin)
        elif target is not None:
            return pallas_cosine_loss_fused(sentence1, sentence2, target,
                                            self.table, margin=0.0)


# ----------------------------- pure-JAX reference -------------------------------
def encode_ref(ids, emb, w_t, b):
    e = emb[ids]                                                        # (B, S, H)
    y = jnp.matmul(e, w_t, precision=lax.Precision.HIGHEST) + b[0]     # (B, S, H)
    return jnp.max(y, axis=1)                                           # (B, H)


def triplet_ref(a, p, n, margin):
    eps = 1e-6
    d_ap = jnp.sqrt(jnp.sum((a - p + eps) ** 2, axis=-1))
    d_an = jnp.sqrt(jnp.sum((a - n + eps) ** 2, axis=-1))
    return jnp.mean(jnp.maximum(d_ap - d_an + margin, 0.0))


def cosine_ref(x1, x2, tgt, margin=0.0):
    eps = 1e-8
    n1 = jnp.sqrt(jnp.sum(x1 * x1, -1))
    n2 = jnp.sqrt(jnp.sum(x2 * x2, -1))
    cos = jnp.sum(x1 * x2, -1) / (jnp.maximum(n1, eps) * jnp.maximum(n2, eps))
    loss = jnp.where(tgt > 0, 1.0 - cos, jnp.maximum(cos - margin, 0.0))
    return jnp.mean(loss)


if __name__ == "__main__":
    import numpy as np

    config = {"vocab_size": VOCAB, "hidden_size": HIDDEN,
              "sentence_len": SENT_LEN, "margin": MARGIN}
    key = jax.random.PRNGKey(0)
    model = SiameseNetworkPallas(config, key)

    k1, k2, k3 = jax.random.split(jax.random.PRNGKey(1), 3)
    s1 = jax.random.randint(k1, (BATCH, SENT_LEN), 0, VOCAB + 1, dtype=jnp.int32)
    s2 = jax.random.randint(k2, (BATCH, SENT_LEN), 0, VOCAB + 1, dtype=jnp.int32)
    s3 = jax.random.randint(k3, (BATCH, SENT_LEN), 0, VOCAB + 1, dtype=jnp.int32)
    target = jnp.array([1.0, -1.0], dtype=jnp.float32)

    # Branch 1: encoder only (one pallas_call, one matmul)
    vec1 = jax.block_until_ready(model(s1))
    # Branch 2: triplet loss (ONE fused pallas_call: 3 encodes + loss)
    trip = jax.block_until_ready(model(s1, s2, s3))
    # Branch 3: cosine embedding loss (ONE fused pallas_call: 2 encodes + loss)
    cosl = jax.block_until_ready(model(s1, s2, target=target))

    # reference checks against the unfused (Embedding -> Linear -> MaxPool) path
    r1 = encode_ref(s1, model.embedding, model.w_t, model.b)
    r2 = encode_ref(s2, model.embedding, model.w_t, model.b)
    r3 = encode_ref(s3, model.embedding, model.w_t, model.b)
    np.testing.assert_allclose(np.asarray(vec1), np.asarray(r1), rtol=1e-5, atol=1e-5)
    np.testing.assert_allclose(np.asarray(trip), np.asarray(triplet_ref(r1, r2, r3, MARGIN)),
                               rtol=1e-5, atol=1e-5)
    np.testing.assert_allclose(np.asarray(cosl), np.asarray(cosine_ref(r1, r2, target)),
                               rtol=1e-5, atol=1e-5)

    print("KERNEL_OK")
</pallas_src>

<mosaic_0001>
module attributes {stable_mosaic.version = 11 : i64} {
  func.func @_encode_kernel(%arg0: memref<16x1xi32, #tpu.memory_space<vmem>>, %arg1: memref<128x32xf32, #tpu.memory_space<vmem>>, %arg2: memref<2x32xf32, #tpu.memory_space<vmem>>) attributes {dimension_semantics = [], scalar_prefetch = 0 : i64, scratch_operands = 0 : i64, tpu.core_type = #tpu.core_type<tc>} {
    %c0 = arith.constant 0 : index
    %c0_0 = arith.constant 0 : index
    %0 = vector.load %arg0[%c0, %c0_0] : memref<16x1xi32, #tpu.memory_space<vmem>>, vector<16x1xi32>
    %1 = tpu.iota {dimensions = array<i32: 1>} : vector<16x128xi32>
    %2 = vector.broadcast %0 : vector<16x1xi32> to vector<16x128xi32>
    %3 = arith.cmpi eq, %2, %1 : vector<16x128xi32>
    %4 = arith.extui %3 : vector<16x128xi1> to vector<16x128xi32>
    %5 = arith.sitofp %4 : vector<16x128xi32> to vector<16x128xf32>
    %c0_1 = arith.constant 0 : index
    %c0_2 = arith.constant 0 : index
    %6 = vector.load %arg1[%c0_1, %c0_2] : memref<128x32xf32, #tpu.memory_space<vmem>>, vector<128x32xf32>
    %cst = arith.constant dense<0.000000e+00> : vector<16x32xf32>
    %7 = tpu.matmul %5, %6, %cst {dimension_numbers = #tpu.dot_dimension_numbers<[1], [0], [0], [1], [0, 0, 1, 1], [], []>} : vector<16x128xf32>, vector<128x32xf32>, vector<16x32xf32> -> vector<16x32xf32>
    %8 = vector.shape_cast %7 : vector<16x32xf32> to vector<2x8x32xf32>
    %cst_3 = arith.constant dense<0xFF800000> : vector<2x32xf32>
    %9 = vector.multi_reduction <maximumf>, %8, %cst_3 [1] : vector<2x8x32xf32> to vector<2x32xf32>
    %c0_4 = arith.constant 0 : index
    %c0_5 = arith.constant 0 : index
    %10 = vector.load %arg2[%c0_4, %c0_5] : memref<2x32xf32, #tpu.memory_space<vmem>>, vector<2x32xf32>
    tpu.vector_store %arg2[%c0_4, %c0_5], %9 {strides = array<i32>} : memref<2x32xf32, #tpu.memory_space<vmem>>, vector<2x32xf32>,
    return
  }
}

</mosaic_0001>

<bundles_post_ra>
// kernel: tpu_custom_call.1
= control target key start
LH: loop header
LB: loop body
LE: loop exit
PB: predicated region body
PF: predicated region fallthrough
CT: control target
= control target key end

     0   :  { %v238_v2 = vmov 0   ;;  %s313_s0 = inlined_call_operand.vmem [shape: s32[16,1], index: 0, kind: input, shape index: {}]   ;;  %s314_s1 = inlined_call_operand.vmem [shape: f32[128,32], index: 1, kind: input, shape index: {}]   ;;  %s315_s2 = inlined_call_operand.hbm [shape: f32[2,32], index: 2, kind: output, shape index: {}]  }
   0x1   :  { %v12_v0 = vld [vmem:[%s313_s0] sm:$0xff]  ;;  %v43_v1 = vld [vmem:[%s314_s1 + $0x78] sm:$0xff]  ;;  %215 = vset.pattern.permute.xlu0 %v238_v2  ;;  %v42_v3 = vld [vmem:[%s314_s1 + $0x70] sm:$0xff] }
   0x2   :  { %177 = vmatprep.subr.mxu0 %v43_v1  ;;  %17 = vperm.xlu0 %215, %v12_v0   ;;  %v41_v4 = vld [vmem:[%s314_s1 + $0x68] sm:$0xff]  ;;  %v40_v6 = vld [vmem:[%s314_s1 + $0x60] sm:$0xff]  ;;  %v39_v7 = vld [vmem:[%s314_s1 + $0x58] sm:$0xff] }
   0x3   :  { %178 = vmatpush3.msra.mxu0 %v43_v1  ;;  %v13_v5 = vld [vmem:[%s313_s0 + $0x8] sm:$0xff] }
   0x4   :  { %179 = vmatprep.subr.mxu0 %v42_v3 }
   0x5   :  { %180 = vmatpush3.msra.mxu0 %v42_v3 }
   0x6   :  { %181 = vmatprep.subr.mxu0 %v41_v4  ;;  %20 = vperm.xlu0 %215, %v13_v5  }
   0x7   :  { %182 = vmatpush3.msra.mxu0 %v41_v4 }
   0x8   :  { %7 = vsyncpa [#allocation3], 0  ;;  %183 = vmatprep.subr.mxu0 %v40_v6  ;;  %v38_v8 = vld [vmem:[%s314_s1 + $0x50] sm:$0xff]  ;;  %v37_v9 = vld [vmem:[%s314_s1 + $0x48] sm:$0xff]  ;;  %v14_v19 = vlaneseq  ;;  %v239_v22 = vmov 1.0   ;;  %vm119_vm2 = vcmask 261120  }
   0x9   :  { %184 = vmatpush3.msra.mxu0 %v40_v6  ;;  %v36_v10 = vld [vmem:[%s314_s1 + $0x40] sm:$0xff]  ;;  %v35_v11 = vld [vmem:[%s314_s1 + $0x38] sm:$0xff]  ;;  %v34_v12 = vld [vmem:[%s314_s1 + $0x30] sm:$0xff]  ;;  %vm136_vm3 = vcmask 1041409   ;;  %vm139_vm4 = vcmask 254976  }
   0xa   :  { %185 = vmatprep.subr.mxu0 %v39_v7  ;;  %v33_v13 = vld [vmem:[%s314_s1 + $0x28] sm:$0xff]  ;;  %v32_v14 = vld [vmem:[%s314_s1 + $0x20] sm:$0xff]  ;;  %v31_v15 = vld [vmem:[%s314_s1 + $0x18] sm:$0xff]  ;;  %v15_v20 = vand.u32 127, %v14_v19 }
   0xb   :  { %186 = vmatpush3.msra.mxu0 %v39_v7  ;;  %v30_v16 = vld [vmem:[%s314_s1 + $0x10] sm:$0xff]  ;;  %v29_v17 = vld [vmem:[%s314_s1 + $0x8] sm:$0xff]  ;;  %v28_v18 = vld [vmem:[%s314_s1] sm:$0xff]  ;;  %s240_s1 = smov [#allocation2]  }
   0xc   :  { %187 = vmatprep.subr.mxu0 %v38_v8  ;;  %s147_s16 = sshll.u32 %s240_s1, 4  ;;  %s148_s16 = int_to_ptr.vmem [resolvable:$true] %s147_s16 }
   0xd   :  { %188 = vmatpush3.msra.mxu0 %v38_v8  ;;  %s216_s17 = scalar_lea.vmem %s148_s16, 32  ;;  %p221_p1 = scmp.lt.s32.totalorder %s148_s16, %s148_s16 }
   0xe   :  { %189 = vmatprep.subr.mxu0 %v37_v9  ;;  %p217_p0 = scmp.ne.s32.totalorder %s148_s16, %s216_s17  ;;  %p222_p2 = scmp.lt.s32.totalorder %s216_s17, %s216_s17 }
   0xf   :  { %190 = vmatpush3.msra.mxu0 %v37_v9 }
  0x10   :  { %191 = vmatprep.subr.mxu0 %v36_v10  ;;  %p223_p3 = por %p222_p2, %p221_p1 }
  0x11   :  { %192 = vmatpush3.msra.mxu0 %v36_v10 }
  0x12   :  { %193 = vmatprep.subr.mxu0 %v35_v11  ;;  %p224_p4 = pnand %p223_p3, %p217_p0 }
  0x13   :  { %194 = vmatpush3.msra.mxu0 %v35_v11 }
  0x14   :  { %195 = vmatprep.subr.mxu0 %v34_v12 }
  0x15   :  { %196 = vmatpush3.msra.mxu0 %v34_v12 }
  0x16   :  { %197 = vmatprep.subr.mxu0 %v33_v13 }
  0x17   :  { %198 = vmatpush3.msra.mxu0 %v33_v13 }
  0x18   :  { %199 = vmatprep.subr.mxu0 %v32_v14 }
  0x19   :  { %200 = vmatpush3.msra.mxu0 %v32_v14 }
  0x1a   :  { %201 = vmatprep.subr.mxu0 %v31_v15 }
  0x1b   :  { %202 = vmatpush3.msra.mxu0 %v31_v15 }
  0x1c   :  { %203 = vmatprep.subr.mxu0 %v30_v16 }
  0x1d   :  { %204 = vmatpush3.msra.mxu0 %v30_v16 }
  0x1e   :  { %205 = vmatprep.subr.mxu0 %v29_v17 }
  0x1f   :  { %206 = vmatpush3.msra.mxu0 %v29_v17 }
  0x20   :  { %207 = vmatprep.subr.mxu0 %v28_v18 }
  0x21   :  { %208 = vmatpush3.msra.mxu0 %v28_v18 }
  0x7d   :  { %v18_v21 = vpop.permute.xlu0 %17 }
  0x7e   :  { %vm22_vm0 = vcmp.eq.s32.totalorder %v18_v21, %v15_v20 }
  0x7f   :  { %209 = vmatprep.mubr.msk.f32.mxu0 %vm22_vm0, %v239_v22 }
  0x81   :  { %v21_v23 = vpop.permute.xlu0 %20 }
  0x82   :  { %vm23_vm1 = vcmp.eq.s32.totalorder %v21_v23, %v15_v20 }
  0x83   :  { %210 = vmatmul.mubr.msk.f32.vlgmr.msra.gmra.mxu0 %vm23_vm1, %v239_v22 }
 0x143   :  { %v211_v24 = vpop.f32.mrf.mxu0 }
 0x144   :  { %v127_v25 = vsel %vm119_vm2, %v211_v24, -inf }
 0x145   :  { %v128_v26 = vrot.slane %v127_v25, 4  ;;  %v110_v27 = vpop.f32.mrf.mxu0 }
 0x146   :  { %v120_v28 = vsel %vm119_vm2, %v110_v27, -inf }
 0x147   :  { %v129_v29 = vmax.f32 %v127_v25, %v128_v26  ;;  %v121_v30 = vrot.slane %v120_v28, 4 }
 0x149   :  { %v130_v31 = vrot.slane %v129_v29, 2  ;;  %v122_v32 = vmax.f32 %v120_v28, %v121_v30 }
 0x14b   :  { %v131_v33 = vmax.f32 %v129_v29, %v130_v31  ;;  %v123_v34 = vrot.slane %v122_v32, 2 }
 0x14d   :  { %v132_v35 = vrot.slane %v131_v33, 1  ;;  %v124_v36 = vmax.f32 %v122_v32, %v123_v34 }
 0x14f   :  { %v125_v37 = vrot.slane %v124_v36, 1  ;;  %v133_v38 = vmax.f32 %v131_v33, %v132_v35 }
 0x151   :  { %v126_v39 = vmax.f32 %v124_v36, %v125_v37 }
 0x153   :  { %v137_v40 = vsel %vm136_vm3, %v133_v38, %v126_v39 }
 0x154   :  { %140 = vst.msk [vmem:[#allocation2] sm:$0x3] %vm139_vm4, %v137_v40 }
 0x155   :  { %227 = shalt.err (!%p224_p4)
}
 0x156   :  { %150 = dma.vmem_to_hbm [thread:$0]  %s148_s16, 32, %s315_s2, [#allocation3]  }
 0x157   :  { %236 = dma.done.wait [#allocation3], 32  }
 0x158   :  { %237 = vsyncadd [#allocation3], 4294967264 }
 0x159   :  { %154 = vsyncpa [#allocation3], 1 }

</bundles_post_ra>
